<compile_context>
chip_gen: v7x
topology: tpu7x:2x2x1
jax: 0.10.0
libtpu: 0.0.40
codegen_flags: <defaults>
</compile_context>

<pallas_src>
import functools
import math

import jax
import jax.numpy as jnp
from jax.experimental import pallas as pl
from jax.experimental.pallas import tpu as pltpu


def _round_up(x: int, m: int) -> int:
    return -(-x // m) * m


def _vmem_capacity_bytes() -> int:
    """Best-effort per-core VMEM capacity; conservative fallback = 64 MiB (v7x)."""
    try:
        cap = int(pltpu.get_tpu_info().vmem_capacity_bytes)
        if cap > 0:
            return cap
    except Exception:
        pass
    return 64 * 1024 * 1024


# ---------------------------------------------------------------------------
# Fast path kernels: table resident in VMEM, gather = one-hot @ table on MXU.
# ---------------------------------------------------------------------------
def _vmem_gather_split_kernel(ids_ref, hi_ref, lo_ref, out_ref, *, vocab, scale):
    """f32 tables, split host-side into bf16 hi/lo so the MXU gather is exact."""
    ids = ids_ref[...]                                          # (T, 1) int32
    iota = jax.lax.broadcasted_iota(jnp.int32, (ids.shape[0], vocab), 1)
    onehot = (ids == iota).astype(jnp.bfloat16)                 # (T, V), 0/1 exact in bf16
    g = jnp.dot(onehot, hi_ref[...], preferred_element_type=jnp.float32)
    g = g + jnp.dot(onehot, lo_ref[...], preferred_element_type=jnp.float32)
    out_ref[...] = (g + scale).astype(out_ref.dtype)            # add in f32, then cast


def _vmem_gather_kernel(ids_ref, tab_ref, out_ref, *, vocab, scale):
    """Sub-f32 (e.g. bf16) tables: single matmul, row selection already exact."""
    ids = ids_ref[...]                                          # (T, 1) int32
    tab = tab_ref[...]                                          # (V, D)
    iota = jax.lax.broadcasted_iota(jnp.int32, (ids.shape[0], vocab), 1)
    onehot = (ids == iota).astype(tab.dtype)                    # (T, V)
    g = jnp.dot(onehot, tab, preferred_element_type=jnp.float32)
    out_ref[...] = (g + scale).astype(out_ref.dtype)            # add in f32, then cast


# ---------------------------------------------------------------------------
# General path kernel: table in HBM, data-dependent row DMAs, double-buffered.
# ---------------------------------------------------------------------------
def _dma_gather_kernel(ids_ref, emb_hbm, out_ref, buf, sem, *, chunk, scale, unroll):
    # ids_ref: SMEM (scalar prefetch).  emb_hbm: raw HBM ref (pl.ANY).
    # buf: VMEM (2, T, D) double-buffered gather scratch.  sem: DMA sems (2,).
    c = pl.program_id(0)
    nc = pl.num_programs(0)
    slot = c % 2

    def start_gather(chunk_idx, slot_idx):
        base = chunk_idx * chunk

        @pl.loop(0, chunk // unroll)
        def _(t):
            row0 = t * unroll
            for u in range(unroll):              # static unroll: pack descriptor issue
                r = row0 + u
                pltpu.make_async_copy(
                    emb_hbm.at[ids_ref[base + r]],   # gathered embedding row (D,)
                    buf.at[slot_idx, r],
                    sem.at[slot_idx],
                ).start()

    # Prime the pipeline on the first grid step.
    @pl.when(c == 0)
    def _():
        start_gather(0, 0)

    # Issue next chunk's gathers BEFORE waiting on this chunk: the SMEM id reads
    # and descriptor pushes overlap the in-flight DMAs and stay ahead of the
    # .wait() (SMEM forwarding-break trap).  buf[1 - slot] was fully consumed at
    # step c - 1, so there is no buffer hazard.
    @pl.when(c + 1 < nc)
    def _():
        start_gather(c + 1, 1 - slot)

    # One aggregate wait for the whole chunk: DMA semaphores count bytes, the T
    # row copies each signal D*itemsize bytes, and this (T, D)-sized descriptor
    # waits for / decrements T*D*itemsize bytes at once.
    pltpu.make_async_copy(
        emb_hbm.at[pl.ds(0, chunk)], buf.at[slot], sem.at[slot]
    ).wait()

    out_ref[...] = (buf[slot].astype(jnp.float32) + scale).astype(out_ref.dtype)


# ---------------------------------------------------------------------------
# Wrapper
# ---------------------------------------------------------------------------
def input_embeddings(
    x: jax.Array,
    emb_table: jax.Array,
    *,
    chunk: int | None = None,
    force_dma: bool = False,
) -> jax.Array:
    """x: (batch, seq_len) int ids; emb_table: (vocab, d_model).
    Returns (batch, seq_len, d_model) = emb_table[x] + sqrt(d_model)."""
    B, S = x.shape
    V, D = emb_table.shape
    N = B * S
    itemsize = jnp.dtype(emb_table.dtype).itemsize
    scale = float(math.sqrt(D))            # Python float -> in-kernel immediate

    # Sublane-packing-aware row alignment: 8 (f32/i32), 16 (bf16), 32 (i8/fp8).
    align = max(8, 32 // itemsize)

    vmem_cap = _vmem_capacity_bytes()
    vmem_limit = int(min(vmem_cap * 3 // 4, 96 * 1024 * 1024))

    table_bytes = V * D * itemsize
    use_vmem_gather = (
        (not force_dma) and table_bytes <= 2 * 1024 * 1024 and V <= 2048
    )

    # Tokens handled per grid step.
    if chunk is not None:
        T = chunk
    elif use_vmem_gather:
        T = 256                                       # out tile + one-hot stay small
    else:
        per_token = 4 * D * itemsize                  # 2 gather bufs + ~2 out tiles
        T = (vmem_limit // 2) // per_token
        T = min(1024, T)                              # cap outstanding row DMAs/chunk
    T = min(T, _round_up(N, align))
    T = max(align, (T // align) * align)

    num_chunks = -(-N // T)
    N_pad = num_chunks * T

    # Clamp ids (guards the data-dependent HBM DMA / one-hot) and pad.
    ids = jnp.clip(x.reshape(N).astype(jnp.int32), 0, V - 1)
    if N_pad != N:
        ids = jnp.pad(ids, (0, N_pad - N))

    if use_vmem_gather:
        ids2d = ids.reshape(N_pad, 1)
        ids_spec = pl.BlockSpec((T, 1), lambda c: (c, 0))
        tab_spec = pl.BlockSpec((V, D), lambda c: (0, 0))     # resident table
        out_spec = pl.BlockSpec((T, D), lambda c: (c, 0))
        common = dict(
            out_shape=jax.ShapeDtypeStruct((N_pad, D), emb_table.dtype),
            grid=(num_chunks,),
            out_specs=out_spec,
            compiler_params=pltpu.CompilerParams(
                dimension_semantics=("parallel",),            # stateless across steps
            ),
            cost_estimate=pl.CostEstimate(
                flops=4 * N_pad * V * D,
                transcendentals=0,
                bytes_accessed=table_bytes + N_pad * D * itemsize + N_pad * 4,
            ),
        )
        if jnp.dtype(emb_table.dtype) == jnp.dtype(jnp.float32):
            # Host-side bf16 hi/lo split -> exact (~2^-17 rel) MXU gather.
            hi = emb_table.astype(jnp.bfloat16)
            lo = (emb_table - hi.astype(jnp.float32)).astype(jnp.bfloat16)
            out_flat = pl.pallas_call(
                functools.partial(_vmem_gather_split_kernel, vocab=V, scale=scale),
                in_specs=[ids_spec, tab_spec, tab_spec],
                **common,
            )(ids2d, hi, lo)
        else:
            out_flat = pl.pallas_call(
                functools.partial(_vmem_gather_kernel, vocab=V, scale=scale),
                in_specs=[ids_spec, tab_spec],
                **common,
            )(ids2d, emb_table)
    else:
        unroll = 8                                   # T is always a multiple of 8
        out_flat = pl.pallas_call(
            functools.partial(_dma_gather_kernel, chunk=T, scale=scale, unroll=unroll),
            out_shape=jax.ShapeDtypeStruct((N_pad, D), emb_table.dtype),
            grid_spec=pltpu.PrefetchScalarGridSpec(
                num_scalar_prefetch=1,                       # token ids -> SMEM
                grid=(num_chunks,),                          # one chunk of T tokens/step
                in_specs=[pl.BlockSpec(memory_space=pl.ANY)],  # table stays in HBM
                out_specs=pl.BlockSpec((T, D), lambda c, ids: (c, 0)),  # dense tiles
                scratch_shapes=[
                    pltpu.VMEM((2, T, D), emb_table.dtype),  # double-buffered gather
                    pltpu.SemaphoreType.DMA((2,)),           # one DMA sem per slot
                ],
            ),
            compiler_params=pltpu.CompilerParams(
                dimension_semantics=("arbitrary",),          # cross-step prefetch state
                vmem_limit_bytes=vmem_limit,
            ),
            cost_estimate=pl.CostEstimate(
                flops=N_pad * D,
                transcendentals=0,
                bytes_accessed=2 * N_pad * D * itemsize + N_pad * 4,
            ),
        )(ids, emb_table)

    if N_pad != N:
        out_flat = out_flat[:N]                      # only pay the slice when padded
    return out_flat.reshape(B, S, D)


if __name__ == "__main__":
    # Small, deterministic setup consistent with the module's forward.
    batch, seq_len = 2, 8
    d_model, vocab_size = 128, 64

    key = jax.random.PRNGKey(0)
    k_emb, k_ids = jax.random.split(key)

    emb_table = (0.02 * jax.random.normal(k_emb, (vocab_size, d_model))).astype(
        jnp.float32
    )
    x = jax.random.randint(k_ids, (batch, seq_len), 0, vocab_size, dtype=jnp.int32)

    # Pure-JAX reference (the reference module ADDS sqrt(d_model)).
    ref = emb_table[x] + jnp.float32(math.sqrt(d_model))

    # 1) Fast path: table resident in VMEM, one-hot MXU gather.
    out_fast = jax.block_until_ready(input_embeddings(x, emb_table))
    assert out_fast.shape == (batch, seq_len, d_model), out_fast.shape
    assert out_fast.dtype == jnp.float32, out_fast.dtype
    assert jnp.allclose(out_fast, ref, atol=1e-5, rtol=1e-5), "fast path mismatch"

    # 2) General path: HBM table + double-buffered row-DMA gather, forced with a
    #    small chunk so priming / prefetch-before-wait / slot switching all run.
    out_dma = jax.block_until_ready(
        input_embeddings(x, emb_table, chunk=8, force_dma=True)
    )
    assert out_dma.shape == (batch, seq_len, d_model), out_dma.shape
    assert jnp.allclose(out_dma, ref, atol=1e-5, rtol=1e-5), "dma path mismatch"

    print("KERNEL_OK")
</pallas_src>

<mosaic_0001>
module attributes {stable_mosaic.version = 11 : i64} {
  func.func @_vmem_gather_split_kernel(%arg0: i32, %arg1: memref<16x1xi32, #tpu.memory_space<vmem>>, %arg2: memref<64x128xbf16, #tpu.memory_space<vmem>>, %arg3: memref<64x128xbf16, #tpu.memory_space<vmem>>, %arg4: memref<16x128xf32, #tpu.memory_space<vmem>>) attributes {dimension_semantics = [#tpu.dimension_semantics<parallel>], iteration_bounds = array<i64: 1>, scalar_prefetch = 0 : i64, scratch_operands = 0 : i64, tpu.core_type = #tpu.core_type<tc>, window_params = [{transform_indices = @transform_0, window_bounds = array<i64: 16, 1>}, {pipeline_mode = #tpu.pipeline_mode<synchronous>, transform_indices = @transform_1, window_bounds = array<i64: 64, 128>}, {pipeline_mode = #tpu.pipeline_mode<synchronous>, transform_indices = @transform_2, window_bounds = array<i64: 64, 128>}, {transform_indices = @transform_3, window_bounds = array<i64: 16, 128>}]} {
    %c0 = arith.constant 0 : index
    %c0_0 = arith.constant 0 : index
    %0 = vector.load %arg1[%c0, %c0_0] : memref<16x1xi32, #tpu.memory_space<vmem>>, vector<16x1xi32>
    %1 = tpu.iota {dimensions = array<i32: 1>} : vector<16x64xi32>
    %2 = vector.broadcast %0 : vector<16x1xi32> to vector<16x64xi32>
    %3 = arith.cmpi eq, %2, %1 : vector<16x64xi32>
    %4 = arith.extui %3 : vector<16x64xi1> to vector<16x64xi32>
    %5 = arith.sitofp %4 : vector<16x64xi32> to vector<16x64xf32>
    %6 = arith.truncf %5 : vector<16x64xf32> to vector<16x64xbf16>
    %c0_1 = arith.constant 0 : index
    %c0_2 = arith.constant 0 : index
    %7 = vector.load %arg2[%c0_1, %c0_2] : memref<64x128xbf16, #tpu.memory_space<vmem>>, vector<64x128xbf16>
    %cst = arith.constant dense<0.000000e+00> : vector<16x128xf32>
    %8 = tpu.matmul %6, %7, %cst {dimension_numbers = #tpu.dot_dimension_numbers<[1], [0], [0], [1], [0, 0, 1, 1], [], []>} : vector<16x64xbf16>, vector<64x128xbf16>, vector<16x128xf32> -> vector<16x128xf32>
    %c0_3 = arith.constant 0 : index
    %c0_4 = arith.constant 0 : index
    %9 = vector.load %arg3[%c0_3, %c0_4] : memref<64x128xbf16, #tpu.memory_space<vmem>>, vector<64x128xbf16>
    %cst_5 = arith.constant dense<0.000000e+00> : vector<16x128xf32>
    %10 = tpu.matmul %6, %9, %cst_5 {dimension_numbers = #tpu.dot_dimension_numbers<[1], [0], [0], [1], [0, 0, 1, 1], [], []>} : vector<16x64xbf16>, vector<64x128xbf16>, vector<16x128xf32> -> vector<16x128xf32>
    %11 = arith.addf %8, %10 : vector<16x128xf32>
    %cst_6 = arith.constant 11.3137083 : f32
    %12 = vector.broadcast %cst_6 : f32 to vector<16x128xf32>
    %13 = arith.addf %11, %12 : vector<16x128xf32>
    %c0_7 = arith.constant 0 : index
    %c0_8 = arith.constant 0 : index
    %14 = vector.load %arg4[%c0_7, %c0_8] : memref<16x128xf32, #tpu.memory_space<vmem>>, vector<16x128xf32>
    tpu.vector_store %arg4[%c0_7, %c0_8], %13 {strides = array<i32>} : memref<16x128xf32, #tpu.memory_space<vmem>>, vector<16x128xf32>,
    return
  }
  func.func @transform_0(%arg0: i32) -> (i32, i32) {
    %c0_i32 = arith.constant 0 : i32
    %c0_i32_0 = arith.constant 0 : i32
    return %arg0, %c0_i32 : i32, i32
  }
  func.func @transform_1(%arg0: i32) -> (i32, i32) {
    %c0_i32 = arith.constant 0 : i32
    %c0_i32_0 = arith.constant 0 : i32
    %c0_i32_1 = arith.constant 0 : i32
    return %c0_i32, %c0_i32_0 : i32, i32
  }
  func.func @transform_2(%arg0: i32) -> (i32, i32) {
    %c0_i32 = arith.constant 0 : i32
    %c0_i32_0 = arith.constant 0 : i32
    %c0_i32_1 = arith.constant 0 : i32
    return %c0_i32, %c0_i32_0 : i32, i32
  }
  func.func @transform_3(%arg0: i32) -> (i32, i32) {
    %c0_i32 = arith.constant 0 : i32
    %c0_i32_0 = arith.constant 0 : i32
    return %arg0, %c0_i32 : i32, i32
  }
}

</mosaic_0001>

<bundles_post_ra>
// kernel: tpu_custom_call.1
= control target key start
LH: loop header
LB: loop body
LE: loop exit
PB: predicated region body
PF: predicated region fallthrough
CT: control target
= control target key end

     0   :  { %8 = vsyncpa [#allocation3], 0  ;;  %s442_s0 = inlined_call_operand.vmem [shape: s32[16,1], index: 0, kind: input, shape index: {}]   ;;  %s443_s1 = inlined_call_operand.hbm [shape: bf16[64,128], index: 1, kind: input, shape index: {}]   ;;  %s444_s2 = inlined_call_operand.hbm [shape: bf16[64,128], index: 2, kind: input, shape index: {}]   ;;  %s445_s3 = inlined_call_operand.hbm [shape: f32[16,128], index: 3, kind: output, shape index: {}]  }
   0x1   :  { %9 = vsyncpa [#allocation6], 0 }
   0x2   :  { %10 = vsyncpa [#allocation4], 0  ;;  %s370_s12 = smov [#allocation2]   ;;  %s298_s16 = scalar_lea.hbm %s443_s1, 512 }
   0x3   :  { %s18_s13 = sshll.u32 %s370_s12, 4  ;;  %p299_p0 = scmp.ne.s32.totalorder %s443_s1, %s298_s16  ;;  %s19_s13 = int_to_ptr.vmem [resolvable:$true] %s18_s13 }
   0x4   :  { %p302_p1 = scmp.lt.u32.totalorder %s298_s16, %s443_s1 }
   0x6   :  { %p304_p2 = pnand %p302_p1, %p299_p0 }
   0x8   :  { %307 = shalt.err (!%p304_p2)
}
   0x9   :  { %s308_s21 = scalar_lea.vmem %s19_s13, 512  ;;  %p313_p4 = scmp.lt.s32.totalorder %s19_s13, %s19_s13 }
   0xa   :  { %p309_p3 = scmp.ne.s32.totalorder %s19_s13, %s308_s21  ;;  %p314_p5 = scmp.lt.s32.totalorder %s308_s21, %s308_s21 }
   0xc   :  { %p315_p6 = por %p314_p5, %p313_p4 }
   0xe   :  { %p316_p7 = pnand %p315_p6, %p309_p3 }
  0x10   :  { %319 = shalt.err (!%p316_p7)
}
  0x11   :  { %s371_s22 = smov 64   ;;  %s372_s23 = smov 4  }
  0x12   :  { %24 = dma.hbm_to_vmem [thread:$0]  %s443_s1, 512, %s19_s13, [#allocation3], %s371_s22, %s371_s22, %s372_s23  }
  0x13   :  { %s373_s26 = smov [#allocation5]   ;;  %s320_s30 = scalar_lea.hbm %s444_s2, 512 }
  0x14   :  { %s30_s27 = sshll.u32 %s373_s26, 4  ;;  %p321_p8 = scmp.ne.s32.totalorder %s444_s2, %s320_s30  ;;  %s31_s27 = int_to_ptr.vmem [resolvable:$true] %s30_s27 }
  0x15   :  { %p324_p9 = scmp.lt.u32.totalorder %s320_s30, %s444_s2 }
  0x17   :  { %p326_p10 = pnand %p324_p9, %p321_p8 }
  0x19   :  { %329 = shalt.err (!%p326_p10)
}
  0x1a   :  { %s330_s8 = scalar_lea.vmem %s31_s27, 512  ;;  %p335_p12 = scmp.lt.s32.totalorder %s31_s27, %s31_s27 }
  0x1b   :  { %p331_p11 = scmp.ne.s32.totalorder %s31_s27, %s330_s8  ;;  %p336_p13 = scmp.lt.s32.totalorder %s330_s8, %s330_s8 }
  0x1d   :  { %p337_p0 = por %p336_p13, %p335_p12 }
  0x1f   :  { %p338_p1 = pnand %p337_p0, %p331_p11 }
  0x21   :  { %341 = shalt.err (!%p338_p1)
}
  0x22   :  { %36 = dma.hbm_to_vmem [thread:$0]  %s444_s2, 512, %s31_s27, [#allocation6], %s371_s22, %s371_s22, %s372_s23  }
  0x23   :  { %364 = dma.done.wait [#allocation3], 512  }
  0x24   :  { %365 = vsyncadd [#allocation3], 4294966784 }
  0x25   :  { %366 = dma.done.wait [#allocation6], 512  }
  0x26   :  { %367 = vsyncadd [#allocation6], 4294966784  ;;  %v374_v0 = vmov 0   ;;  %v375_v1 = vmov 0.0   ;;  %v44_v2 = vld [vmem:[%s442_s0] sm:$0xff]  ;;  %v45_v3 = vld [vmem:[%s442_s0 + $0x8] sm:$0xff]  ;;  %v46_v12 = vlaneseq }
  0x27   :  { %289 = vset.pattern.permute.xlu0 %v374_v0  ;;  %255 = vmatprep.subr.bf16.mxu0 %v375_v1  ;;  %v290_v4 = vld [vmem:[#allocation5] sm:$0xff]   ;;  %v292_v6 = vld [vmem:[#allocation5 + $0x8] sm:$0xff]   ;;  %v294_v8 = vld [vmem:[#allocation5 + $0x10] sm:$0xff]   ;;  %vm376_vm0 = vmmov 0   ;;  %vm101_vm3 = vcmask 523264   ;;  %s377_s0 = smov [#allocation7]  }
  0x28   :  { %267 = vmatprep.subr.bf16.mxu1 %v375_v1  ;;  %49 = vperm.xlu0 %289, %v44_v2   ;;  %v291_v5 = vld [vmem:[#allocation2] sm:$0xff]   ;;  %v293_v7 = vld [vmem:[#allocation2 + $0x8] sm:$0xff]   ;;  %v295_v9 = vld [vmem:[#allocation2 + $0x10] sm:$0xff]   ;;  %v47_v13 = vand.u32 127, %v46_v12  ;;  %s220_s2 = sshll.u32 %s377_s0, 4  ;;  %s221_s2 = int_to_ptr.vmem [resolvable:$true] %s220_s2 }
  0x29   :  { %256 = vmatpush3.bf16.msra.mxu0 %v290_v4  ;;  %268 = vmatpush3.bf16.msra.mxu1 %v291_v5  ;;  %v296_v10 = vld [vmem:[#allocation5 + $0x18] sm:$0xff]   ;;  %s342_s14 = scalar_lea.vmem %s221_s2, 256  ;;  %p347_p3 = scmp.lt.s32.totalorder %s221_s2, %s221_s2 }
  0x2a   :  { %257 = vmatprep.subr.bf16.mxu0 %v375_v1  ;;  %269 = vmatprep.subr.bf16.mxu1 %v375_v1  ;;  %v297_v11 = vld [vmem:[#allocation2 + $0x18] sm:$0xff]   ;;  %p343_p2 = scmp.ne.s32.totalorder %s221_s2, %s342_s14  ;;  %p348_p4 = scmp.lt.s32.totalorder %s342_s14, %s342_s14 }
  0x2b   :  { %263 = vmatprep.mubr.msk.bf16.mxu0 %vm376_vm0, %v375_v1  ;;  %275 = vmatprep.mubr.msk.bf16.mxu1 %vm376_vm0, %v375_v1 }
  0x2c   :  { %52 = vperm.xlu0 %289, %v45_v3   ;;  %p349_p5 = por %p348_p4, %p347_p3 }
  0x2d   :  { %258 = vmatpush3.bf16.msra.mxu0 %v292_v6  ;;  %270 = vmatpush3.bf16.msra.mxu1 %v293_v7 }
  0x2e   :  { %259 = vmatprep.subr.bf16.mxu0 %v375_v1  ;;  %271 = vmatprep.subr.bf16.mxu1 %v375_v1  ;;  %p350_p6 = pnand %p349_p5, %p343_p2 }
  0x31   :  { %260 = vmatpush3.bf16.msra.mxu0 %v294_v8  ;;  %272 = vmatpush3.bf16.msra.mxu1 %v295_v9 }
  0x32   :  { %261 = vmatprep.subr.bf16.mxu0 %v375_v1  ;;  %273 = vmatprep.subr.bf16.mxu1 %v375_v1 }
  0x35   :  { %262 = vmatpush3.bf16.msra.mxu0 %v296_v10  ;;  %274 = vmatpush3.bf16.msra.mxu1 %v297_v11 }
  0xa7   :  { %v50_v14 = vpop.permute.xlu0 %49 }
  0xa8   :  { %vm54_vm1 = vcmp.eq.s32.totalorder %v50_v14, %v47_v13 }
  0xa9   :  { %v233_v16 = vsel %vm54_vm1, 1.0, %v375_v1 }
  0xab   :  { %v53_v15 = vpop.permute.xlu0 %52 }
  0xac   :  { %vm55_vm2 = vcmp.eq.s32.totalorder %v53_v15, %v47_v13 }
  0xad   :  { %v234_v17 = vsel %vm55_vm2, 1.0, %v375_v1 }
  0xae   :  { %v60_v18 = vpack.c.bf16 %v234_v17, %v233_v16 }
  0xb0   :  { %264 = vmatmul.mubr.msk.bf16.vlgmr.msra.gmra.mrb[0].mxu0 %vm101_vm3, %v60_v18  ;;  %276 = vmatmul.mubr.msk.bf16.vlgmr.msra.gmra.mrb[0].mxu1 %vm101_vm3, %v60_v18 }
 0x183   :  { %v139_v19 = vpop.f32.mrb[0].mxu0  ;;  %v204_v20 = vpop.f32.mrb[0].mxu1 }
 0x184   :  { %v205_v21 = vadd.f32 %v204_v20, %v139_v19  ;;  %v265_v22 = vpop.f32.mrb[1].mxu0  ;;  %v277_v23 = vpop.f32.mrb[1].mxu1 }
 0x185   :  { %v142_v24 = vpop.f32.mrb[2].mxu0  ;;  %v207_v25 = vpop.f32.mrb[2].mxu1 }
 0x186   :  { %v211_v26 = vadd.f32 11.313708, %v205_v21  ;;  %v208_v27 = vadd.f32 %v207_v25, %v142_v24  ;;  %v266_v28 = vpop.f32.mrb[3].mxu0  ;;  %v278_v29 = vpop.f32.mrb[3].mxu1 }
 0x188   :  { %213 = vst [vmem:[#allocation7] sm:$0xff] %v211_v26  ;;  %v212_v30 = vadd.f32 11.313708, %v208_v27 }
 0x18a   :  { %214 = vst [vmem:[#allocation7 + $0x8] sm:$0xff] %v212_v30 }
 0x18b   :  { %353 = shalt.err (!%p350_p6)
}
 0x18c   :  { %s354_s17 = scalar_lea.hbm %s445_s3, 256 }
 0x18d   :  { %p355_p7 = scmp.ne.s32.totalorder %s445_s3, %s354_s17  ;;  %p358_p8 = scmp.lt.u32.totalorder %s354_s17, %s445_s3 }
 0x18f   :  { %p360_p9 = pnand %p358_p8, %p355_p7 }
 0x191   :  { %363 = shalt.err (!%p360_p9)
}
 0x192   :  { %s378_s22 = smov 128   ;;  %s379_s23 = smov 8  }
 0x193   :  { %226 = dma.vmem_to_hbm [thread:$0]  %s221_s2, 256, %s445_s3, [#allocation4], %s378_s22, %s378_s22, %s379_s23  }
 0x194   :  { %368 = dma.done.wait [#allocation4], 256  }
 0x195   :  { %369 = vsyncadd [#allocation4], 4294967040 }
 0x196   :  { %230 = vsyncpa [#allocation3], 1 }
 0x197   :  { %231 = vsyncpa [#allocation6], 1 }
 0x198   :  { %232 = vsyncpa [#allocation4], 1 }

</bundles_post_ra>
